<compile_context>
chip_gen: v7x
topology: tpu7x:2x2x1
jax: 0.10.0
libtpu: 0.0.40
codegen_flags: <defaults>
</compile_context>

<pallas_src>
import jax
import jax.numpy as jnp
from jax.experimental import pallas as pl
from jax.experimental.pallas import tpu as pltpu


def _round_up(n, m):
    return ((n + m - 1) // m) * m


def _cdiv(a, b):
    return (a + b - 1) // b


def mlp_kernel(x_ref, w1_ref, b1_ref, w2_ref, b2_ref, w3_ref, b3_ref, o_ref):
    # Batch-on-lanes: x_ref is (D, TB) bf16; every layer output is (features, TB).
    xT = x_ref[...]                                                      # (D, TB) bf16

    # fc1 + ReLU: (64, D) @ (D, TB) -> (64, TB), f32 accumulate on the MXU.
    h1 = jnp.dot(w1_ref[...], xT, preferred_element_type=jnp.float32) + b1_ref[...]
    h1 = jnp.maximum(h1, 0.0)

    # fc2 + ReLU: (32, 64) @ (64, TB) -> (32, TB), bf16 operands, f32 accumulate.
    h2 = jnp.dot(w2_ref[...], h1.astype(jnp.bfloat16),
                 preferred_element_type=jnp.float32) + b2_ref[...]
    h2 = jnp.maximum(h2, 0.0)

    # fc3 + sigmoid: (1, 32) @ (32, TB) -> (1, TB)  (single MXU push per 256 lanes).
    logits = jnp.dot(w3_ref[...], h2.astype(jnp.bfloat16),
                     preferred_element_type=jnp.float32) + b3_ref[...]
    o_ref[...] = pl.reciprocal(1.0 + jnp.exp(-logits), approx=True)      # EUP exp + EUP recip


def concept_classifier_forward(x, params, *, block_b=8192):
    """x: (B, input_dim) float32; params in PyTorch nn.Linear layout (weights (out, in))."""
    B, D = x.shape
    LANE = 128

    b_lane = _round_up(B, LANE)
    tb = min(_round_up(block_b, LANE), b_lane)
    # v7x megacore: ensure >= 2 grid tiles when the batch is big enough to split.
    if b_lane // tb < 2 and tb >= 2 * LANE:
        tb = _round_up(_cdiv(b_lane, 2), LANE)
    b_pad = _round_up(B, tb)
    grid = (b_pad // tb,)

    # Transpose to (D, B), zero-pad the lane/batch axis, feed x and all weights as bf16.
    xT = jnp.zeros((D, b_pad), jnp.bfloat16).at[:, :B].set(x.T.astype(jnp.bfloat16))
    w1 = params["w1"].astype(jnp.bfloat16)   # (64, D)
    w2 = params["w2"].astype(jnp.bfloat16)   # (32, 64)
    w3 = params["w3"].astype(jnp.bfloat16)   # (1, 32)

    def resident():
        # Untiled, VMEM-resident for the whole kernel.
        return pl.BlockSpec(memory_space=pltpu.MemorySpace.VMEM)

    out = pl.pallas_call(
        mlp_kernel,
        out_shape=jax.ShapeDtypeStruct((1, b_pad), jnp.float32),
        grid=grid,
        in_specs=[
            pl.BlockSpec((D, tb), lambda i: (0, i)),   # xT: tiled along the lane/batch axis
            resident(),  # w1 (64, D) bf16
            resident(),  # b1 (64, 1) f32
            resident(),  # w2 (32, 64) bf16
            resident(),  # b2 (32, 1) f32
            resident(),  # w3 (1, 32) bf16
            resident(),  # b3 (1, 1) f32
        ],
        out_specs=pl.BlockSpec((1, tb), lambda i: (0, i)),
        compiler_params=pltpu.CompilerParams(
            dimension_semantics=("parallel",),         # shard batch tiles across TCs on v7x
        ),
    )(xT, w1, params["b1"], w2, params["b2"], w3, params["b3"])

    return out[0, :B].reshape(B, 1)


def init_params(input_dim, key):
    """Deterministic init mirroring nn.Linear shapes (weights stored (out, in))."""
    k1, k2, k3, k4, k5, k6 = jax.random.split(key, 6)

    def uniform(k, shape, fan_in):
        bound = 1.0 / jnp.sqrt(jnp.float32(fan_in))
        return jax.random.uniform(k, shape, jnp.float32, -bound, bound)

    return {
        "w1": uniform(k1, (64, input_dim), input_dim),
        "b1": uniform(k2, (64, 1), input_dim),
        "w2": uniform(k3, (32, 64), 64),
        "b2": uniform(k4, (32, 1), 64),
        "w3": uniform(k5, (1, 32), 32),
        "b3": uniform(k6, (1, 1), 32),
    }


def reference_forward(x, params):
    # Mirror the kernel's bf16 rounding of activations/weights so the check isolates the kernel.
    f32 = lambda a: a.astype(jnp.bfloat16).astype(jnp.float32)
    h1 = jnp.maximum(f32(x) @ f32(params["w1"]).T + params["b1"].T, 0.0)
    h2 = jnp.maximum(f32(h1) @ f32(params["w2"]).T + params["b2"].T, 0.0)
    logits = f32(h2) @ f32(params["w3"]).T + params["b3"].T
    return jax.nn.sigmoid(logits)


if __name__ == "__main__":
    key = jax.random.PRNGKey(0)
    k_x, k_x2, k_p = jax.random.split(key, 3)

    input_dim = 16  # X_train.shape[1] stand-in
    params = init_params(input_dim, k_p)

    # Small single-tile case.
    x = jax.random.normal(k_x, (8, input_dim), jnp.float32)
    out = jax.block_until_ready(concept_classifier_forward(x, params))
    ref = reference_forward(x, params)
    assert out.shape == (8, 1)
    assert jnp.allclose(out, ref, atol=1e-2, rtol=1e-2)

    # Multi-tile case with a padded (partial) last tile (exercises the lane-axis grid).
    x2 = jax.random.normal(k_x2, (300, input_dim), jnp.float32)
    out2 = jax.block_until_ready(concept_classifier_forward(x2, params, block_b=128))
    ref2 = reference_forward(x2, params)
    assert out2.shape == (300, 1)
    assert jnp.allclose(out2, ref2, atol=1e-2, rtol=1e-2)

    print("KERNEL_OK")
</pallas_src>

<mosaic_0001>
module attributes {stable_mosaic.version = 11 : i64} {
  func.func @mlp_kernel(%arg0: i32, %arg1: memref<16x128xbf16, #tpu.memory_space<vmem>>, %arg2: memref<64x16xbf16, #tpu.memory_space<vmem>>, %arg3: memref<64x1xf32, #tpu.memory_space<vmem>>, %arg4: memref<32x64xbf16, #tpu.memory_space<vmem>>, %arg5: memref<32x1xf32, #tpu.memory_space<vmem>>, %arg6: memref<1x32xbf16, #tpu.memory_space<vmem>>, %arg7: memref<1x1xf32, #tpu.memory_space<vmem>>, %arg8: memref<1x128xf32, #tpu.memory_space<vmem>>) attributes {dimension_semantics = [#tpu.dimension_semantics<parallel>], iteration_bounds = array<i64: 1>, scalar_prefetch = 0 : i64, scratch_operands = 0 : i64, tpu.core_type = #tpu.core_type<tc>, window_params = [{transform_indices = @transform_0, window_bounds = array<i64: 16, 128>}, {pipeline_mode = #tpu.pipeline_mode<synchronous>, transform_indices = @transform_1, window_bounds = array<i64: 64, 16>}, {pipeline_mode = #tpu.pipeline_mode<synchronous>, transform_indices = @transform_2, window_bounds = array<i64: 64, 1>}, {pipeline_mode = #tpu.pipeline_mode<synchronous>, transform_indices = @transform_3, window_bounds = array<i64: 32, 64>}, {pipeline_mode = #tpu.pipeline_mode<synchronous>, transform_indices = @transform_4, window_bounds = array<i64: 32, 1>}, {pipeline_mode = #tpu.pipeline_mode<synchronous>, transform_indices = @transform_5, window_bounds = array<i64: 1, 32>}, {pipeline_mode = #tpu.pipeline_mode<synchronous>, transform_indices = @transform_6, window_bounds = array<i64: 1, 1>}, {transform_indices = @transform_7, window_bounds = array<i64: 1, 128>}]} {
    %c0 = arith.constant 0 : index
    %c0_0 = arith.constant 0 : index
    %0 = vector.load %arg1[%c0, %c0_0] : memref<16x128xbf16, #tpu.memory_space<vmem>>, vector<16x128xbf16>
    %c0_1 = arith.constant 0 : index
    %c0_2 = arith.constant 0 : index
    %1 = vector.load %arg2[%c0_1, %c0_2] : memref<64x16xbf16, #tpu.memory_space<vmem>>, vector<64x16xbf16>
    %cst = arith.constant dense<0.000000e+00> : vector<64x128xf32>
    %2 = tpu.matmul %1, %0, %cst {dimension_numbers = #tpu.dot_dimension_numbers<[1], [0], [0], [1], [0, 0, 1, 1], [], []>} : vector<64x16xbf16>, vector<16x128xbf16>, vector<64x128xf32> -> vector<64x128xf32>
    %c0_3 = arith.constant 0 : index
    %c0_4 = arith.constant 0 : index
    %3 = vector.load %arg3[%c0_3, %c0_4] : memref<64x1xf32, #tpu.memory_space<vmem>>, vector<64x1xf32>
    %4 = vector.broadcast %3 : vector<64x1xf32> to vector<64x128xf32>
    %5 = arith.addf %2, %4 : vector<64x128xf32>
    %cst_5 = arith.constant 0.000000e+00 : f32
    %6 = vector.broadcast %cst_5 : f32 to vector<64x128xf32>
    %7 = arith.maximumf %5, %6 : vector<64x128xf32>
    %c0_6 = arith.constant 0 : index
    %c0_7 = arith.constant 0 : index
    %8 = vector.load %arg4[%c0_6, %c0_7] : memref<32x64xbf16, #tpu.memory_space<vmem>>, vector<32x64xbf16>
    %9 = arith.truncf %7 : vector<64x128xf32> to vector<64x128xbf16>
    %cst_8 = arith.constant dense<0.000000e+00> : vector<32x128xf32>
    %10 = tpu.matmul %8, %9, %cst_8 {dimension_numbers = #tpu.dot_dimension_numbers<[1], [0], [0], [1], [0, 0, 1, 1], [], []>} : vector<32x64xbf16>, vector<64x128xbf16>, vector<32x128xf32> -> vector<32x128xf32>
    %c0_9 = arith.constant 0 : index
    %c0_10 = arith.constant 0 : index
    %11 = vector.load %arg5[%c0_9, %c0_10] : memref<32x1xf32, #tpu.memory_space<vmem>>, vector<32x1xf32>
    %12 = vector.broadcast %11 : vector<32x1xf32> to vector<32x128xf32>
    %13 = arith.addf %10, %12 : vector<32x128xf32>
    %cst_11 = arith.constant 0.000000e+00 : f32
    %14 = vector.broadcast %cst_11 : f32 to vector<32x128xf32>
    %15 = arith.maximumf %13, %14 : vector<32x128xf32>
    %c0_12 = arith.constant 0 : index
    %c0_13 = arith.constant 0 : index
    %16 = vector.load %arg6[%c0_12, %c0_13] : memref<1x32xbf16, #tpu.memory_space<vmem>>, vector<1x32xbf16>
    %17 = arith.truncf %15 : vector<32x128xf32> to vector<32x128xbf16>
    %cst_14 = arith.constant dense<0.000000e+00> : vector<1x128xf32>
    %18 = tpu.matmul %16, %17, %cst_14 {dimension_numbers = #tpu.dot_dimension_numbers<[1], [0], [0], [1], [0, 0, 1, 1], [], []>} : vector<1x32xbf16>, vector<32x128xbf16>, vector<1x128xf32> -> vector<1x128xf32>
    %c0_15 = arith.constant 0 : index
    %c0_16 = arith.constant 0 : index
    %19 = vector.load %arg7[%c0_15, %c0_16] : memref<1x1xf32, #tpu.memory_space<vmem>>, vector<1x1xf32>
    %20 = vector.broadcast %19 : vector<1x1xf32> to vector<1x128xf32>
    %21 = arith.addf %18, %20 : vector<1x128xf32>
    %cst_17 = arith.constant 0.000000e+00 : f32
    %22 = vector.broadcast %cst_17 : f32 to vector<1x128xf32>
    %23 = arith.subf %22, %21 : vector<1x128xf32>
    %24 = math.exp %23 : vector<1x128xf32>
    %cst_18 = arith.constant 1.000000e+00 : f32
    %25 = vector.broadcast %cst_18 : f32 to vector<1x128xf32>
    %26 = arith.addf %25, %24 : vector<1x128xf32>
    %27 = tpu.reciprocal %26 {approx = true} : vector<1x128xf32> -> vector<1x128xf32>
    %c0_19 = arith.constant 0 : index
    %c0_20 = arith.constant 0 : index
    %28 = vector.load %arg8[%c0_19, %c0_20] : memref<1x128xf32, #tpu.memory_space<vmem>>, vector<1x128xf32>
    tpu.vector_store %arg8[%c0_19, %c0_20], %27 {strides = array<i32>} : memref<1x128xf32, #tpu.memory_space<vmem>>, vector<1x128xf32>,
    return
  }
  func.func @transform_0(%arg0: i32) -> (i32, i32) {
    %c0_i32 = arith.constant 0 : i32
    %c0_i32_0 = arith.constant 0 : i32
    return %c0_i32, %arg0 : i32, i32
  }
  func.func @transform_1(%arg0: i32) -> (i32, i32) {
    %c0_i32 = arith.constant 0 : i32
    %c0_i32_0 = arith.constant 0 : i32
    %c0_i32_1 = arith.constant 0 : i32
    return %c0_i32, %c0_i32_0 : i32, i32
  }
  func.func @transform_2(%arg0: i32) -> (i32, i32) {
    %c0_i32 = arith.constant 0 : i32
    %c0_i32_0 = arith.constant 0 : i32
    %c0_i32_1 = arith.constant 0 : i32
    return %c0_i32, %c0_i32_0 : i32, i32
  }
  func.func @transform_3(%arg0: i32) -> (i32, i32) {
    %c0_i32 = arith.constant 0 : i32
    %c0_i32_0 = arith.constant 0 : i32
    %c0_i32_1 = arith.constant 0 : i32
    return %c0_i32, %c0_i32_0 : i32, i32
  }
  func.func @transform_4(%arg0: i32) -> (i32, i32) {
    %c0_i32 = arith.constant 0 : i32
    %c0_i32_0 = arith.constant 0 : i32
    %c0_i32_1 = arith.constant 0 : i32
    return %c0_i32, %c0_i32_0 : i32, i32
  }
  func.func @transform_5(%arg0: i32) -> (i32, i32) {
    %c0_i32 = arith.constant 0 : i32
    %c0_i32_0 = arith.constant 0 : i32
    %c0_i32_1 = arith.constant 0 : i32
    return %c0_i32, %c0_i32_0 : i32, i32
  }
  func.func @transform_6(%arg0: i32) -> (i32, i32) {
    %c0_i32 = arith.constant 0 : i32
    %c0_i32_0 = arith.constant 0 : i32
    %c0_i32_1 = arith.constant 0 : i32
    return %c0_i32, %c0_i32_0 : i32, i32
  }
  func.func @transform_7(%arg0: i32) -> (i32, i32) {
    %c0_i32 = arith.constant 0 : i32
    %c0_i32_0 = arith.constant 0 : i32
    return %c0_i32, %arg0 : i32, i32
  }
}

</mosaic_0001>

<bundles_post_ra>
// kernel: tpu_custom_call.1
= control target key start
LH: loop header
LB: loop body
LE: loop exit
PB: predicated region body
PF: predicated region fallthrough
CT: control target
= control target key end

     0   :  { %s603_s0 = inlined_call_operand.vmem [shape: bf16[16,128], index: 0, kind: input, shape index: {}]   ;;  %s604_s1 = inlined_call_operand.vmem [shape: bf16[64,16], index: 1, kind: input, shape index: {}]   ;;  %s605_s2 = inlined_call_operand.vmem [shape: f32[64,1], index: 2, kind: input, shape index: {}]   ;;  %s606_s3 = inlined_call_operand.vmem [shape: bf16[32,64], index: 3, kind: input, shape index: {}]   ;;  %s607_s4 = inlined_call_operand.vmem [shape: f32[32,1], index: 4, kind: input, shape index: {}]   ;;  %s608_s5 = inlined_call_operand.vmem [shape: bf16[1,32], index: 5, kind: input, shape index: {}]   ;;  %s609_s6 = inlined_call_operand.<no memory space> [shape: f32[1,1], index: 6, kind: input, shape index: {}]   ;;  %s610_s7 = inlined_call_operand.hbm [shape: f32[1,128], index: 7, kind: output, shape index: {}]  }
   0x1   :  { %v12_v0 = vstv %s609_s6 }
   0x2   :  { %13 = vst [vmem:[#allocation2] sm:$0x1] %v12_v0 }
   0x3   :  { %v443_v1 = vld [vmem:[%s603_s0] sm:$0xff]   ;;  %vm114_vm0 = vcmask 130048   ;;  %v445_v3 = vld [vmem:[%s604_s1 + $0x8] sm:$0xff]   ;;  %v478_v4 = vmov 0   ;;  %v446_v5 = vld [vmem:[%s604_s1 + $0x10] sm:$0xff]  }
   0x4   :  { %v444_v2 = vld [vmem:[%s604_s1] sm:$0xff]   ;;  %407 = vmatprep.subr.bf16.mxu0 %v443_v1  ;;  %441 = vset.pattern.permute.xlu0 %v478_v4  ;;  %v42_v7 = vld [vmem:[%s605_s2 + $0x10] sm:$0xff]  ;;  %v41_v8 = vld [vmem:[%s605_s2 + $0x8] sm:$0xff] }
   0x5   :  { %408 = vmatpush3.bf16.msra.mxu0 %v443_v1  ;;  %409 = vmatprep.mubr.msk.bf16.mxu0 %vm114_vm0, %v444_v2  ;;  %v40_v6 = vld [vmem:[%s605_s2] sm:$0xff]  ;;  %v43_v9 = vld [vmem:[%s605_s2 + $0x18] sm:$0xff] }
   0x6   :  { %442 = vset.pattern.permute.xlu1 %v478_v4  ;;  %50 = vperm.xlu0 %441, %v40_v6   ;;  %v447_v10 = vld [vmem:[%s604_s1 + $0x18] sm:$0xff]  }
   0x7   :  { %60 = vperm.xlu1 %442, %v42_v7  }
   0x8   :  { %410 = vmatmul.mubr.msk.bf16.vlgmr.msra.gmra.mrb[0].mxu0 %vm114_vm0, %v445_v3 }
   0x9   :  { %413 = vmatprep.mubr.msk.bf16.mxu0 %vm114_vm0, %v446_v5 }
   0xa   :  { %55 = vperm.xlu0 %441, %v41_v8  }
   0xb   :  { %14 = vsyncpa [#allocation4], 0  ;;  %v44_v11 = vld [vmem:[%s605_s2 + $0x20] sm:$0xff]  ;;  %65 = vperm.xlu1 %442, %v43_v9   ;;  %v45_v12 = vld [vmem:[%s605_s2 + $0x28] sm:$0xff]  ;;  %vm242_vm1 = vcmask 523264   ;;  %v479_v58 = vmov 0.0  }
   0xc   :  { %v46_v13 = vld [vmem:[%s605_s2 + $0x30] sm:$0xff]  ;;  %v47_v14 = vld [vmem:[%s605_s2 + $0x38] sm:$0xff]  ;;  %v208_v15 = vld [vmem:[%s607_s4] sm:$0xff]  ;;  %429 = vmatprep.subr.bf16.mxu0 %v479_v58  ;;  %vm480_vm2 = vmmov 0   ;;  %vm315_vm3 = vcmask 261120   ;;  %s481_s12 = smov [#allocation3]  }
   0xd   :  { %v209_v16 = vld [vmem:[%s607_s4 + $0x8] sm:$0xff]  ;;  %v210_v17 = vld [vmem:[%s607_s4 + $0x10] sm:$0xff]  ;;  %v211_v18 = vld [vmem:[%s607_s4 + $0x18] sm:$0xff] }
   0xe   :  { %70 = vperm.xlu0 %441, %v44_v11   ;;  %v305_v19 = vld [vmem:[#allocation2] sm:$0x1]  ;;  %v449_v57 = vld [vmem:[%s606_s3 + $0x8] sm:$0xff]  }
   0xf   :  { %75 = vperm.xlu1 %442, %v45_v12   ;;  %v448_v20 = vld [vmem:[%s606_s3] sm:$0xff]  }
  0x10   :  { %414 = vmatmul.mubr.msk.bf16.gmra.mrb[4].mxu0 %vm114_vm0, %v447_v10  ;;  %425 = vmatprep.mubr.msk.bf16.mxu1 %vm242_vm1, %v448_v20 }
  0x11   :  { %433 = vmatprep.mubr.msk.bf16.mxu0 %vm480_vm2, %v479_v58 }
  0x12   :  { %80 = vperm.xlu0 %441, %v46_v13   ;;  %v302_v13 = vld [vmem:[%s608_s5] sm:$0x1]  ;;  %s371_s5 = sshll.u32 %s481_s12, 4  ;;  %s372_s5 = int_to_ptr.vmem [resolvable:$true] %s371_s5 }
  0x13   :  { %85 = vperm.xlu1 %442, %v47_v14   ;;  %v311_v14 = vlaneseq  ;;  %s454_s13 = scalar_lea.vmem %s372_s5, 16  ;;  %s458_s14 = scalar_lea.vmem %s372_s5, 32 }
  0x14   :  { %p455_p0 = scmp.ne.s32.totalorder %s372_s5, %s454_s13  ;;  %p459_p1 = scmp.lt.s32.totalorder %s372_s5, %s372_s5 }
  0x15   :  { %p460_p2 = scmp.lt.s32.totalorder %s458_s14, %s454_s13 }
  0x16   :  { %214 = vperm.xlu0 %441, %v208_v15   ;;  %v312_v15 = vshrl.u32 %v311_v14, 7 }
  0x17   :  { %219 = vperm.xlu1 %442, %v209_v16   ;;  %p461_p3 = por %p460_p2, %p459_p1 }
  0x18   :  { %v313_v16 = vsub.s32 0, %v312_v15 }
  0x19   :  { %p462_p4 = pnand %p461_p3, %p455_p0 }
  0x1a   :  { %224 = vperm.xlu0 %441, %v210_v17  }
  0x1b   :  { %229 = vperm.xlu1 %442, %v211_v18  }
  0x1e   :  { %308 = vperm.xlu0 %441, %v305_v19  }
  0x85   :  { %v51_v21 = vpop.permute.xlu0 %50 }
  0x86   :  { %v61_v22 = vpop.permute.xlu1 %60 }
  0x89   :  { %v56_v23 = vpop.permute.xlu0 %55 }
  0x8a   :  { %v66_v24 = vpop.permute.xlu1 %65 }
  0x8d   :  { %v71_v28 = vpop.permute.xlu0 %70 }
  0x8e   :  { %v76_v33 = vpop.permute.xlu1 %75 }
  0x91   :  { %v81_v40 = vpop.permute.xlu0 %80 }
  0x92   :  { %v86_v45 = vpop.permute.xlu1 %85 }
  0x95   :  { %v215_v59 = vpop.permute.xlu0 %214 }
  0x96   :  { %v220_v60 = vpop.permute.xlu1 %219 }
  0x99   :  { %v225_v61 = vpop.permute.xlu0 %224 }
  0x9a   :  { %v230_v1 = vpop.permute.xlu1 %229 }
  0x9d   :  { %v309_v17 = vpop.permute.xlu0 %308 }
  0x9e   :  { %v314_v18 = vrot.slane %v309_v17, %v313_v16 }
  0xdb   :  { %v411_v25 = vpop.f32.mrb[0].mxu0 }
  0xdc   :  { %v170_v26 = vadd.f32 %v411_v25, %v61_v22  ;;  %v161_v27 = vpop.f32.mrb[1].mxu0 }
  0xdd   :  { %v162_v29 = vadd.f32 %v161_v27, %v51_v21  ;;  %v412_v30 = vpop.f32.mrb[2].mxu0 }
  0xde   :  { %v173_v31 = vadd.f32 %v412_v30, %v66_v24  ;;  %v164_v32 = vpop.f32.mrb[3].mxu0  ;;  %v194_v35 = vmax.f32 %v170_v26, 0.0 }
  0xdf   :  { %v165_v34 = vadd.f32 %v164_v32, %v56_v23  ;;  %v192_v37 = vmax.f32 %v162_v29, 0.0 }
  0xe0   :  { %v195_v36 = vmax.f32 %v173_v31, 0.0 }
  0xe1   :  { %v193_v38 = vmax.f32 %v165_v34, 0.0 }
  0xe2   :  { %v205_v39 = vpack.c.bf16 %v195_v36, %v194_v35 }
  0xe3   :  { %v415_v41 = vpop.f32.mrb[4].mxu0  ;;  %v204_v42 = vpack.c.bf16 %v193_v38, %v192_v37 }
  0xe4   :  { %v186_v43 = vadd.f32 %v415_v41, %v81_v40  ;;  %v177_v44 = vpop.f32.mrb[5].mxu0 }
  0xe5   :  { %v178_v46 = vadd.f32 %v177_v44, %v71_v28  ;;  %v416_v47 = vpop.f32.mrb[6].mxu0  ;;  %417 = vmatprep.subr.bf16.mxu1 %v204_v42 }
  0xe6   :  { %v189_v48 = vadd.f32 %v416_v47, %v86_v45  ;;  %v180_v49 = vpop.f32.mrb[7].mxu0  ;;  %418 = vmatpush3.bf16.msra.mxu1 %v204_v42  ;;  %v198_v51 = vmax.f32 %v186_v43, 0.0 }
  0xe7   :  { %v181_v50 = vadd.f32 %v180_v49, %v76_v33  ;;  %419 = vmatprep.subr.bf16.mxu1 %v205_v39  ;;  %v196_v53 = vmax.f32 %v178_v46, 0.0 }
  0xe8   :  { %v199_v52 = vmax.f32 %v189_v48, 0.0 }
  0xe9   :  { %v197_v54 = vmax.f32 %v181_v50, 0.0 }
  0xea   :  { %v207_v55 = vpack.c.bf16 %v199_v52, %v198_v51  ;;  %420 = vmatpush3.bf16.msra.mxu1 %v205_v39 }
  0xeb   :  { %v206_v56 = vpack.c.bf16 %v197_v54, %v196_v53 }
  0xed   :  { %421 = vmatprep.subr.bf16.mxu1 %v206_v56 }
  0xee   :  { %422 = vmatpush3.bf16.msra.mxu1 %v206_v56 }
  0xef   :  { %423 = vmatprep.subr.bf16.mxu1 %v207_v55 }
  0xf2   :  { %424 = vmatpush3.bf16.msra.mxu1 %v207_v55 }
  0xf5   :  { %426 = vmatmul.mubr.msk.bf16.vlgmr.msra.gmra.mrb[0].mxu1 %vm242_vm1, %v449_v57 }
 0x1c8   :  { %v427_v62 = vpop.f32.mrb[0].mxu1 }
 0x1c9   :  { %v292_v63 = vadd.f32 %v427_v62, %v225_v61  ;;  %v283_v0 = vpop.f32.mrb[1].mxu1 }
 0x1ca   :  { %v284_v2 = vadd.f32 %v283_v0, %v215_v59  ;;  %v428_v3 = vpop.f32.mrb[2].mxu1 }
 0x1cb   :  { %v295_v4 = vadd.f32 %v428_v3, %v230_v1  ;;  %v286_v5 = vpop.f32.mrb[3].mxu1  ;;  %v300_v7 = vmax.f32 %v292_v63, 0.0 }
 0x1cc   :  { %v287_v6 = vadd.f32 %v286_v5, %v220_v60  ;;  %v298_v9 = vmax.f32 %v284_v2, 0.0 }
 0x1cd   :  { %v301_v8 = vmax.f32 %v295_v4, 0.0 }
 0x1ce   :  { %v299_v10 = vmax.f32 %v287_v6, 0.0 }
 0x1cf   :  { %v304_v11 = vpack.c.bf16 %v301_v8, %v300_v7 }
 0x1d0   :  { %v303_v12 = vpack.c.bf16 %v299_v10, %v298_v9 }
 0x1d2   :  { %430 = vmatpush3.bf16.msra.mxu0 %v303_v12 }
 0x1d3   :  { %431 = vmatprep.subr.bf16.mxu0 %v479_v58 }
 0x1d6   :  { %432 = vmatpush3.bf16.msra.mxu0 %v304_v11 }
 0x1d9   :  { %434 = vmatmul.mubr.msk.bf16.vlgmr.msra.gmra.mrb[8].mxu0 %vm315_vm3, %v302_v13 }
 0x2ac   :  { %v353_v19 = vpop.f32.mrb[8].mxu0 }
 0x2ad   :  { %v354_v20 = vadd.f32 %v353_v19, %v314_v18  ;;  %v435_v21 = vpop.f32.mrb[9].mxu0 }
 0x2ae   :  { %v356_v22 = vpop.f32.mrb[10].mxu0 }
 0x2af   :  { %v359_v23 = vsub.f32 0.0, %v354_v20  ;;  %v436_v24 = vpop.f32.mrb[11].mxu0 }
 0x2b1   :  { %v360_v25 = vmul.f32 1.442695, %v359_v23 }
 0x2b3   :  { %450 = vpow2.f32 %v360_v25 }
 0x2bd   :  { %v451_v26 = vpop.eup %450 }
 0x2be   :  { %v362_v27 = vadd.f32 1.0, %v451_v26 }
 0x2c0   :  { %452 = vrcp.f32 %v362_v27 }
 0x2ca   :  { %v453_v28 = vpop.eup %452 }
 0x2cb   :  { %364 = vst [vmem:[#allocation3] sm:$0x1] %v453_v28 }
 0x2cc   :  { %465 = shalt.err (!%p462_p4)
}
 0x2cd   :  { %s466_s17 = scalar_lea.hbm %s610_s7, 16 }
 0x2ce   :  { %p467_p5 = scmp.ne.s32.totalorder %s610_s7, %s466_s17  ;;  %p470_p6 = scmp.lt.u32.totalorder %s466_s17, %s610_s7 }
 0x2d0   :  { %p472_p7 = pnand %p470_p6, %p467_p5 }
 0x2d2   :  { %475 = shalt.err (!%p472_p7)
}
 0x2d3   :  { %374 = dma.vmem_to_hbm [thread:$0]  %s372_s5, 16, %s610_s7, [#allocation4]  }
 0x2d4   :  { %476 = dma.done.wait [#allocation4], 16  }
 0x2d5   :  { %477 = vsyncadd [#allocation4], 4294967280 }
 0x2d6   :  { %378 = vsyncpa [#allocation4], 1 }

</bundles_post_ra>
